<compile_context>
chip_gen: v6e
topology: v6e:2x2x1
jax: 0.10.0
libtpu: 0.0.40
codegen_flags: <defaults>
</compile_context>

<pallas_src>
import jax
import jax.numpy as jnp
from jax.experimental import pallas as pl
from jax.experimental.pallas import tpu as pltpu


def _mlp_kernel(x_ref, w1_ref, b1_ref, w2_ref, b2_ref, w3_ref, b3_ref, o_ref):
    # Fused: Linear -> ReLU -> (Dropout = identity, eval) -> Linear -> ReLU -> Linear
    x = x_ref[...]                                                    # (TB, F) native layout
    # (64, F) . (TB, F) contracting the feature axis of BOTH operands -> (64, TB).
    # The operand "transpose" happens on-chip (MXU/XLU path) and hides under the
    # input DMA; no wrapper-side HBM transpose of x.
    h1 = jax.lax.dot_general(
        w1_ref[...], x, (((1,), (1,)), ((), ())),
        preferred_element_type=jnp.float32)                           # (64, TB)
    h1 = jnp.maximum(h1 + b1_ref[...], 0.0)                           # ReLU
    h2 = jnp.dot(w2_ref[...], h1,
                 preferred_element_type=jnp.float32)                  # (32, TB)
    h2 = jnp.maximum(h2 + b2_ref[...], 0.0)                           # ReLU
    out = jnp.dot(w3_ref[...], h2,
                  preferred_element_type=jnp.float32)                 # (1, TB) lane-dense
    o_ref[...] = (out + b3_ref[...]).astype(o_ref.dtype)


def _round_up(n, m):
    return -(-n // m) * m


def _derive_batch_tile(B, F, vmem_budget_bytes):
    """VMEM-budgeted, lane-aligned batch tile."""
    # f32 bytes per batch lane resident in VMEM: double-buffered (TB, F) input
    # tile, double-buffered (1, TB) output tile, and the h1/h2/out temporaries.
    bytes_per_lane = 2 * 4 * F + 2 * 4 + 4 * (64 + 32 + 1)
    tb = vmem_budget_bytes // bytes_per_lane
    tb = max(128, (tb // 128) * 128)
    tb = min(tb, 32768)                       # diminishing returns past ~32K lanes
    b_pad = _round_up(B, 128)
    tb = min(tb, b_pad)                       # never exceed the (128-padded) batch
    if b_pad >= 256:
        # Guarantee >= 2 grid steps so the "parallel" axis feeds both v7x cores.
        tb = min(tb, _round_up(-(-b_pad // 2), 128))
    return tb


def reference_forward(x, params):
    """Plain-JAX reference (also the small-batch fallback path)."""
    w1, b1, w2, b2, w3, b3 = params
    h1 = jnp.maximum(x @ w1.T + b1.T, 0.0)
    h2 = jnp.maximum(h1 @ w2.T + b2.T, 0.0)
    return h2 @ w3.T + b3.T


def f1_predictor_forward(x, params, *, batch_tile=None,
                         vmem_budget_bytes=16 * 1024 * 1024,
                         min_pallas_batch=1024):
    """x: (B, inputSize) float32. Returns (B, 1) float32."""
    w1, b1, w2, b2, w3, b3 = params
    B, F = x.shape

    # Small-batch fallback: for tiny B the fused XLA dots beat any kernel launch.
    if B < min_pallas_batch:
        return reference_forward(x, params)

    if batch_tile is None:
        batch_tile = _derive_batch_tile(B, F, vmem_budget_bytes)
    else:
        # Round user-supplied tiles to a multiple of 128 (BlockSpec lane rule)
        # and never exceed the 128-padded batch.
        batch_tile = min(_round_up(max(batch_tile, 128), 128), _round_up(B, 128))
    grid_b = pl.cdiv(B, batch_tile)

    # Params are tiny and constant across grid steps -> keep them VMEM-resident.
    full = lambda a: pl.BlockSpec(a.shape, lambda i: (0, 0))

    out_t = pl.pallas_call(
        _mlp_kernel,
        out_shape=jax.ShapeDtypeStruct((1, B), jnp.float32),
        grid_spec=pltpu.PrefetchScalarGridSpec(
            num_scalar_prefetch=0,
            grid=(grid_b,),
            in_specs=[
                pl.BlockSpec((batch_tile, F), lambda i: (i, 0)),   # x, native (B, F)
                full(w1), full(b1),
                full(w2), full(b2),
                full(w3), full(b3),
            ],
            out_specs=pl.BlockSpec((1, batch_tile), lambda i: (0, i)),
        ),
        compiler_params=pltpu.CompilerParams(
            # Batch axis is embarrassingly parallel -> megacore sharding on v7x.
            dimension_semantics=("parallel",),
            # 32 MiB: raises v5e's 16 MiB scoped default, stays within v7x's
            # 64 MiB physical VMEM; the 16 MiB tile budget leaves ~2x headroom.
            vmem_limit_bytes=32 * 1024 * 1024,
        ),
    )(x, w1, b1, w2, b2, w3, b3)

    # (1, B) -> (B, 1): one dim is size 1, so this is a free reshape of a tiny array.
    return jnp.reshape(out_t, (B, 1))


def init_params(key, input_size):
    """Deterministic init mirroring PyTorch Linear (weights stored (out, in))."""
    ks = jax.random.split(key, 6)

    def linear(kw, kb, fan_in, fan_out):
        bound = 1.0 / jnp.sqrt(jnp.float32(fan_in))
        w = jax.random.uniform(kw, (fan_out, fan_in), jnp.float32, -bound, bound)
        b = jax.random.uniform(kb, (fan_out, 1), jnp.float32, -bound, bound)
        return w, b

    w1, b1 = linear(ks[0], ks[1], input_size, 64)
    w2, b2 = linear(ks[2], ks[3], 64, 32)
    w3, b3 = linear(ks[4], ks[5], 32, 1)
    return (w1, b1, w2, b2, w3, b3)


if __name__ == "__main__":
    key = jax.random.PRNGKey(0)
    k_x, k_p, k_x2, k_x3 = jax.random.split(key, 4)

    input_size = 16
    params = init_params(k_p, input_size)

    # MXU f32 matmuls may be decomposed into bf16 passes depending on chip /
    # default precision, so compare with a tolerance far below any real bug
    # (wrong layout / bias would be O(0.1 - 1) off) but above bf16 rounding.
    TOL = dict(atol=5e-3, rtol=5e-3)

    # Small synthetic batch: force the Pallas path (single ragged 128-lane tile).
    x_small = jax.random.normal(k_x, (16, input_size), dtype=jnp.float32)
    out_small = jax.block_until_ready(
        f1_predictor_forward(x_small, params, min_pallas_batch=0))
    ref_small = reference_forward(x_small, params)
    assert out_small.shape == (16, 1)
    assert jnp.allclose(out_small, ref_small, **TOL), "mismatch (small, Pallas)"

    # Non-multiple-of-128 batch: ragged last block + 2 "parallel" grid steps.
    x_mid = jax.random.normal(k_x2, (300, input_size), dtype=jnp.float32)
    out_mid = jax.block_until_ready(
        f1_predictor_forward(x_mid, params, min_pallas_batch=0))
    ref_mid = reference_forward(x_mid, params)
    assert out_mid.shape == (300, 1)
    assert jnp.allclose(out_mid, ref_mid, **TOL), "mismatch (ragged, Pallas)"

    # Batch above the fallback threshold: Pallas path with the VMEM-budgeted tile.
    x_big = jax.random.normal(k_x3, (2048, input_size), dtype=jnp.float32)
    out_big = jax.block_until_ready(f1_predictor_forward(x_big, params))
    ref_big = reference_forward(x_big, params)
    assert out_big.shape == (2048, 1)
    assert jnp.allclose(out_big, ref_big, **TOL), "mismatch (large, Pallas)"

    # Default small-batch path (plain XLA fallback) still matches exactly.
    out_fb = jax.block_until_ready(f1_predictor_forward(x_small, params))
    assert jnp.allclose(out_fb, ref_small, atol=1e-6, rtol=1e-6), "mismatch (fallback)"

    print("KERNEL_OK")
</pallas_src>

<mosaic_0001>
module attributes {stable_mosaic.version = 11 : i64} {
  func.func @_mlp_kernel(%arg0: i32, %arg1: memref<128x16xf32, #tpu.memory_space<vmem>>, %arg2: memref<64x16xf32, #tpu.memory_space<vmem>>, %arg3: memref<64x1xf32, #tpu.memory_space<vmem>>, %arg4: memref<32x64xf32, #tpu.memory_space<vmem>>, %arg5: memref<32x1xf32, #tpu.memory_space<vmem>>, %arg6: memref<1x32xf32, #tpu.memory_space<vmem>>, %arg7: memref<1x1xf32, #tpu.memory_space<vmem>>, %arg8: memref<1x128xf32, #tpu.memory_space<vmem>>) attributes {dimension_semantics = [#tpu.dimension_semantics<parallel>], iteration_bounds = array<i64: 1>, scalar_prefetch = 0 : i64, scratch_operands = 0 : i64, tpu.core_type = #tpu.core_type<tc>, window_params = [{transform_indices = @transform_0, window_bounds = array<i64: 128, 16>}, {pipeline_mode = #tpu.pipeline_mode<synchronous>, transform_indices = @transform_1, window_bounds = array<i64: 64, 16>}, {pipeline_mode = #tpu.pipeline_mode<synchronous>, transform_indices = @transform_2, window_bounds = array<i64: 64, 1>}, {pipeline_mode = #tpu.pipeline_mode<synchronous>, transform_indices = @transform_3, window_bounds = array<i64: 32, 64>}, {pipeline_mode = #tpu.pipeline_mode<synchronous>, transform_indices = @transform_4, window_bounds = array<i64: 32, 1>}, {pipeline_mode = #tpu.pipeline_mode<synchronous>, transform_indices = @transform_5, window_bounds = array<i64: 1, 32>}, {pipeline_mode = #tpu.pipeline_mode<synchronous>, transform_indices = @transform_6, window_bounds = array<i64: 1, 1>}, {transform_indices = @transform_7, window_bounds = array<i64: 1, 128>}]} {
    %c0 = arith.constant 0 : index
    %c0_0 = arith.constant 0 : index
    %0 = vector.load %arg1[%c0, %c0_0] : memref<128x16xf32, #tpu.memory_space<vmem>>, vector<128x16xf32>
    %c0_1 = arith.constant 0 : index
    %c0_2 = arith.constant 0 : index
    %1 = vector.load %arg2[%c0_1, %c0_2] : memref<64x16xf32, #tpu.memory_space<vmem>>, vector<64x16xf32>
    %cst = arith.constant dense<0.000000e+00> : vector<64x128xf32>
    %2 = tpu.matmul %1, %0, %cst {dimension_numbers = #tpu.dot_dimension_numbers<[1], [1], [0], [0], [0, 0, 1, 0], [], []>} : vector<64x16xf32>, vector<128x16xf32>, vector<64x128xf32> -> vector<64x128xf32>
    %c0_3 = arith.constant 0 : index
    %c0_4 = arith.constant 0 : index
    %3 = vector.load %arg3[%c0_3, %c0_4] : memref<64x1xf32, #tpu.memory_space<vmem>>, vector<64x1xf32>
    %4 = vector.broadcast %3 : vector<64x1xf32> to vector<64x128xf32>
    %5 = arith.addf %2, %4 : vector<64x128xf32>
    %cst_5 = arith.constant 0.000000e+00 : f32
    %6 = vector.broadcast %cst_5 : f32 to vector<64x128xf32>
    %7 = arith.maximumf %5, %6 : vector<64x128xf32>
    %c0_6 = arith.constant 0 : index
    %c0_7 = arith.constant 0 : index
    %8 = vector.load %arg4[%c0_6, %c0_7] : memref<32x64xf32, #tpu.memory_space<vmem>>, vector<32x64xf32>
    %cst_8 = arith.constant dense<0.000000e+00> : vector<32x128xf32>
    %9 = tpu.matmul %8, %7, %cst_8 {dimension_numbers = #tpu.dot_dimension_numbers<[1], [0], [0], [1], [0, 0, 1, 1], [], []>} : vector<32x64xf32>, vector<64x128xf32>, vector<32x128xf32> -> vector<32x128xf32>
    %c0_9 = arith.constant 0 : index
    %c0_10 = arith.constant 0 : index
    %10 = vector.load %arg5[%c0_9, %c0_10] : memref<32x1xf32, #tpu.memory_space<vmem>>, vector<32x1xf32>
    %11 = vector.broadcast %10 : vector<32x1xf32> to vector<32x128xf32>
    %12 = arith.addf %9, %11 : vector<32x128xf32>
    %cst_11 = arith.constant 0.000000e+00 : f32
    %13 = vector.broadcast %cst_11 : f32 to vector<32x128xf32>
    %14 = arith.maximumf %12, %13 : vector<32x128xf32>
    %c0_12 = arith.constant 0 : index
    %c0_13 = arith.constant 0 : index
    %15 = vector.load %arg6[%c0_12, %c0_13] : memref<1x32xf32, #tpu.memory_space<vmem>>, vector<1x32xf32>
    %cst_14 = arith.constant dense<0.000000e+00> : vector<1x128xf32>
    %16 = tpu.matmul %15, %14, %cst_14 {dimension_numbers = #tpu.dot_dimension_numbers<[1], [0], [0], [1], [0, 0, 1, 1], [], []>} : vector<1x32xf32>, vector<32x128xf32>, vector<1x128xf32> -> vector<1x128xf32>
    %c0_15 = arith.constant 0 : index
    %c0_16 = arith.constant 0 : index
    %17 = vector.load %arg7[%c0_15, %c0_16] : memref<1x1xf32, #tpu.memory_space<vmem>>, vector<1x1xf32>
    %18 = vector.broadcast %17 : vector<1x1xf32> to vector<1x128xf32>
    %19 = arith.addf %16, %18 : vector<1x128xf32>
    %c0_17 = arith.constant 0 : index
    %c0_18 = arith.constant 0 : index
    %20 = vector.load %arg8[%c0_17, %c0_18] : memref<1x128xf32, #tpu.memory_space<vmem>>, vector<1x128xf32>
    tpu.vector_store %arg8[%c0_17, %c0_18], %19 {strides = array<i32>} : memref<1x128xf32, #tpu.memory_space<vmem>>, vector<1x128xf32>,
    return
  }
  func.func @transform_0(%arg0: i32) -> (i32, i32) {
    %c0_i32 = arith.constant 0 : i32
    %c0_i32_0 = arith.constant 0 : i32
    return %arg0, %c0_i32 : i32, i32
  }
  func.func @transform_1(%arg0: i32) -> (i32, i32) {
    %c0_i32 = arith.constant 0 : i32
    %c0_i32_0 = arith.constant 0 : i32
    %c0_i32_1 = arith.constant 0 : i32
    return %c0_i32, %c0_i32_0 : i32, i32
  }
  func.func @transform_2(%arg0: i32) -> (i32, i32) {
    %c0_i32 = arith.constant 0 : i32
    %c0_i32_0 = arith.constant 0 : i32
    %c0_i32_1 = arith.constant 0 : i32
    return %c0_i32, %c0_i32_0 : i32, i32
  }
  func.func @transform_3(%arg0: i32) -> (i32, i32) {
    %c0_i32 = arith.constant 0 : i32
    %c0_i32_0 = arith.constant 0 : i32
    %c0_i32_1 = arith.constant 0 : i32
    return %c0_i32, %c0_i32_0 : i32, i32
  }
  func.func @transform_4(%arg0: i32) -> (i32, i32) {
    %c0_i32 = arith.constant 0 : i32
    %c0_i32_0 = arith.constant 0 : i32
    %c0_i32_1 = arith.constant 0 : i32
    return %c0_i32, %c0_i32_0 : i32, i32
  }
  func.func @transform_5(%arg0: i32) -> (i32, i32) {
    %c0_i32 = arith.constant 0 : i32
    %c0_i32_0 = arith.constant 0 : i32
    %c0_i32_1 = arith.constant 0 : i32
    return %c0_i32, %c0_i32_0 : i32, i32
  }
  func.func @transform_6(%arg0: i32) -> (i32, i32) {
    %c0_i32 = arith.constant 0 : i32
    %c0_i32_0 = arith.constant 0 : i32
    %c0_i32_1 = arith.constant 0 : i32
    return %c0_i32, %c0_i32_0 : i32, i32
  }
  func.func @transform_7(%arg0: i32) -> (i32, i32) {
    %c0_i32 = arith.constant 0 : i32
    %c0_i32_0 = arith.constant 0 : i32
    return %c0_i32, %arg0 : i32, i32
  }
}

</mosaic_0001>

<bundles_post_ra>
// kernel: tpu_custom_call.1
= control target key start
LH: loop header
LB: loop body
LE: loop exit
PB: predicated region body
PF: predicated region fallthrough
CT: control target
= control target key end

     0   :  { %s909_s0 = inlined_call_operand.vmem [shape: f32[16,16], index: 0, kind: input, shape index: {}]   ;;  %s910_s1 = inlined_call_operand.vmem [shape: f32[64,16], index: 1, kind: input, shape index: {}]   ;;  %s911_s2 = inlined_call_operand.vmem [shape: f32[64,1], index: 2, kind: input, shape index: {}]   ;;  %s912_s3 = inlined_call_operand.vmem [shape: f32[32,64], index: 3, kind: input, shape index: {}]   ;;  %s913_s4 = inlined_call_operand.vmem [shape: f32[32,1], index: 4, kind: input, shape index: {}]   ;;  %s914_s5 = inlined_call_operand.vmem [shape: f32[1,32], index: 5, kind: input, shape index: {}]   ;;  %s915_s6 = inlined_call_operand.<no memory space> [shape: f32[1,1], index: 6, kind: input, shape index: {}]   ;;  %s916_s7 = inlined_call_operand.hbm [shape: f32[1,16], index: 7, kind: output, shape index: {}]  }
   0x1   :  { %v12_v0 = vstv %s915_s6 }
   0x2   :  { %13 = vst [vmem:[#allocation2] sm:$0x1] %v12_v0 }
   0x3   :  { %v44_v1 = vld [vmem:[%s909_s0 + $0x78] sm:$0xff]  ;;  %vm101_vm0 = vcmask 130048   ;;  %v43_v2 = vld [vmem:[%s909_s0 + $0x70] sm:$0xff]  ;;  %v692_v3 = vmov 0   ;;  %v42_v4 = vld [vmem:[%s909_s0 + $0x68] sm:$0xff] }
   0x4   :  { %587 = vmatprep.subr.msk.mxu0 %vm101_vm0, %v44_v1  ;;  %668 = vset.pattern.permute.xlu0 %v692_v3  ;;  %v45_v5 = vld [vmem:[%s910_s1] sm:$0xff]  ;;  %v60_v7 = vld [vmem:[%s911_s2 + $0x38] sm:$0xff]  ;;  %v58_v8 = vld [vmem:[%s911_s2 + $0x28] sm:$0xff] }
   0x5   :  { %588 = vmatpush3.xpose.msk.msra.mxu0 %vm101_vm0, %v44_v1  ;;  %669 = vset.pattern.permute.xlu1 %v692_v3  ;;  %v41_v6 = vld [vmem:[%s909_s0 + $0x60] sm:$0xff]  ;;  %v59_v9 = vld [vmem:[%s911_s2 + $0x30] sm:$0xff]  ;;  %v40_v11 = vld [vmem:[%s909_s0 + $0x58] sm:$0xff] }
   0x6   :  { %589 = vmatprep.subr.msk.mxu0 %vm101_vm0, %v43_v2  ;;  %619 = vmatprep.mubr.msk.f32.mxu0 %vm101_vm0, %v45_v5  ;;  %v57_v10 = vld [vmem:[%s911_s2 + $0x20] sm:$0xff] }
   0x7   :  { %98 = vperm.xlu0 %668, %v60_v7   ;;  %88 = vperm.xlu1 %669, %v58_v8  }
   0x9   :  { %590 = vmatpush3.xpose.msk.msra.mxu0 %vm101_vm0, %v43_v2 }
   0xa   :  { %591 = vmatprep.subr.msk.mxu0 %vm101_vm0, %v42_v4 }
   0xd   :  { %592 = vmatpush3.xpose.msk.msra.mxu0 %vm101_vm0, %v42_v4 }
   0xe   :  { %593 = vmatprep.subr.msk.mxu0 %vm101_vm0, %v41_v6 }
   0xf   :  { %14 = vsyncpa [#allocation4], 0  ;;  %93 = vperm.xlu0 %668, %v59_v9   ;;  %83 = vperm.xlu1 %669, %v57_v10   ;;  %v56_v12 = vld [vmem:[%s911_s2 + $0x18] sm:$0xff]  ;;  %v55_v13 = vld [vmem:[%s911_s2 + $0x10] sm:$0xff]  ;;  %vm315_vm1 = vcmask 523264   ;;  %vm694_vm2 = vmmov 0  }
  0x10   :  { %v39_v14 = vld [vmem:[%s909_s0 + $0x50] sm:$0xff]  ;;  %v54_v15 = vld [vmem:[%s911_s2 + $0x8] sm:$0xff]  ;;  %v53_v16 = vld [vmem:[%s911_s2] sm:$0xff]  ;;  %vm428_vm3 = vcmask 261120   ;;  %s695_s29 = smov [#allocation3]  }
  0x11   :  { %594 = vmatpush3.xpose.msk.msra.mxu0 %vm101_vm0, %v41_v6  ;;  %v38_v17 = vld [vmem:[%s909_s0 + $0x48] sm:$0xff]  ;;  %v294_v18 = vld [vmem:[%s913_s4 + $0x18] sm:$0xff]  ;;  %v293_v19 = vld [vmem:[%s913_s4 + $0x10] sm:$0xff]  ;;  %s509_s6 = sshll.u32 %s695_s29, 4  ;;  %s510_s6 = int_to_ptr.vmem [resolvable:$true] %s509_s6 }
  0x12   :  { %595 = vmatprep.subr.msk.mxu0 %vm101_vm0, %v40_v11  ;;  %v37_v20 = vld [vmem:[%s909_s0 + $0x40] sm:$0xff]  ;;  %v292_v21 = vld [vmem:[%s913_s4 + $0x8] sm:$0xff]  ;;  %v36_v23 = vld [vmem:[%s909_s0 + $0x38] sm:$0xff]  ;;  %s670_s30 = scalar_lea.vmem %s510_s6, 16  ;;  %s674_s8 = scalar_lea.vmem %s510_s6, 32 }
  0x13   :  { %78 = vperm.xlu0 %668, %v56_v12   ;;  %73 = vperm.xlu1 %669, %v55_v13   ;;  %v291_v22 = vld [vmem:[%s913_s4] sm:$0xff]  ;;  %v35_v25 = vld [vmem:[%s909_s0 + $0x30] sm:$0xff]  ;;  %v34_v26 = vld [vmem:[%s909_s0 + $0x28] sm:$0xff]  ;;  %p671_p0 = scmp.ne.s32.totalorder %s510_s6, %s670_s30  ;;  %p675_p1 = scmp.lt.s32.totalorder %s510_s6, %s510_s6 }
  0x14   :  { %v418_v24 = vld [vmem:[#allocation2] sm:$0x1]  ;;  %v32_v28 = vld [vmem:[%s909_s0 + $0x18] sm:$0xff]  ;;  %v31_v29 = vld [vmem:[%s909_s0 + $0x10] sm:$0xff]  ;;  %p676_p2 = scmp.lt.s32.totalorder %s674_s8, %s670_s30 }
  0x15   :  { %596 = vmatpush3.xpose.msk.msra.mxu0 %vm101_vm0, %v40_v11  ;;  %v33_v27 = vld [vmem:[%s909_s0 + $0x20] sm:$0xff]  ;;  %v30_v30 = vld [vmem:[%s909_s0 + $0x8] sm:$0xff]  ;;  %v47_v33 = vld [vmem:[%s910_s1 + $0x10] sm:$0xff]  ;;  %v693_v11 = vmov 0.0  }
  0x16   :  { %597 = vmatprep.subr.msk.mxu0 %vm101_vm0, %v39_v14  ;;  %v29_v31 = vld [vmem:[%s909_s0] sm:$0xff]  ;;  %v46_v32 = vld [vmem:[%s910_s1 + $0x8] sm:$0xff]  ;;  %v48_v34 = vld [vmem:[%s910_s1 + $0x18] sm:$0xff]  ;;  %p677_p3 = por %p676_p2, %p675_p1 }
  0x17   :  { %68 = vperm.xlu0 %668, %v54_v15   ;;  %63 = vperm.xlu1 %669, %v53_v16   ;;  %v49_v35 = vld [vmem:[%s910_s1 + $0x20] sm:$0xff]  ;;  %v50_v36 = vld [vmem:[%s910_s1 + $0x28] sm:$0xff]  ;;  %v51_v37 = vld [vmem:[%s910_s1 + $0x30] sm:$0xff] }
  0x18   :  { %v52_v38 = vld [vmem:[%s910_s1 + $0x38] sm:$0xff]  ;;  %v287_v39 = vld [vmem:[%s912_s3] sm:$0xff]  ;;  %v288_v8 = vld [vmem:[%s912_s3 + $0x8] sm:$0xff]  ;;  %p678_p4 = pnand %p677_p3, %p671_p0 }
  0x19   :  { %598 = vmatpush3.xpose.msk.msra.mxu0 %vm101_vm0, %v39_v14  ;;  %647 = vmatprep.mubr.msk.f32.mxu1 %vm315_vm1, %v287_v39  ;;  %v289_v9 = vld [vmem:[%s912_s3 + $0x10] sm:$0xff]  ;;  %v290_v10 = vld [vmem:[%s912_s3 + $0x18] sm:$0xff] }
  0x1a   :  { %599 = vmatprep.subr.msk.mxu0 %vm101_vm0, %v38_v17 }
  0x1b   :  { %312 = vperm.xlu0 %668, %v294_v18   ;;  %307 = vperm.xlu1 %669, %v293_v19  }
  0x1d   :  { %600 = vmatpush3.xpose.msk.msra.mxu0 %vm101_vm0, %v38_v17 }
  0x1e   :  { %601 = vmatprep.subr.msk.mxu0 %vm101_vm0, %v37_v20 }
  0x1f   :  { %302 = vperm.xlu0 %668, %v292_v21   ;;  %297 = vperm.xlu1 %669, %v291_v22  }
  0x21   :  { %602 = vmatpush3.xpose.msk.msra.mxu0 %vm101_vm0, %v37_v20 }
  0x22   :  { %603 = vmatprep.subr.msk.mxu0 %vm101_vm0, %v36_v23 }
  0x23   :  { %421 = vperm.xlu0 %668, %v418_v24  }
  0x25   :  { %604 = vmatpush3.xpose.msk.msra.mxu0 %vm101_vm0, %v36_v23 }
  0x26   :  { %605 = vmatprep.subr.msk.mxu0 %vm101_vm0, %v35_v25 }
  0x29   :  { %606 = vmatpush3.xpose.msk.msra.mxu0 %vm101_vm0, %v35_v25 }
  0x2a   :  { %607 = vmatprep.subr.msk.mxu0 %vm101_vm0, %v34_v26 }
  0x2d   :  { %608 = vmatpush3.xpose.msk.msra.mxu0 %vm101_vm0, %v34_v26 }
  0x2e   :  { %609 = vmatprep.subr.msk.mxu0 %vm101_vm0, %v33_v27 }
  0x31   :  { %610 = vmatpush3.xpose.msk.msra.mxu0 %vm101_vm0, %v33_v27 }
  0x32   :  { %611 = vmatprep.subr.msk.mxu0 %vm101_vm0, %v32_v28 }
  0x35   :  { %612 = vmatpush3.xpose.msk.msra.mxu0 %vm101_vm0, %v32_v28  ;;  %v417_v28 = vld [vmem:[%s914_s5] sm:$0x1] }
  0x36   :  { %613 = vmatprep.subr.msk.mxu0 %vm101_vm0, %v31_v29 }
  0x39   :  { %614 = vmatpush3.xpose.msk.msra.mxu0 %vm101_vm0, %v31_v29  ;;  %v424_v29 = vlaneseq }
  0x3a   :  { %615 = vmatprep.subr.msk.mxu0 %vm101_vm0, %v30_v30 }
  0x3d   :  { %616 = vmatpush3.xpose.msk.msra.mxu0 %vm101_vm0, %v30_v30  ;;  %v425_v30 = vshrl.u32 %v424_v29, 7 }
  0x3e   :  { %617 = vmatprep.subr.msk.mxu0 %vm101_vm0, %v29_v31 }
  0x41   :  { %618 = vmatpush3.xpose.msk.msra.mxu0 %vm101_vm0, %v29_v31  ;;  %v426_v31 = vsub.s32 0, %v425_v30 }
  0x44   :  { %620 = vmatmul.mubr.msk.f32.vlgmr.msra.gmra.mxu0 %vm101_vm0, %v46_v32 }
  0x45   :  { %622 = vmatprep.mubr.msk.f32.mxu0 %vm101_vm0, %v47_v33 }
  0x48   :  { %623 = vmatmul.mubr.msk.f32.gmra.mxu0 %vm101_vm0, %v48_v34 }
  0x49   :  { %625 = vmatprep.mubr.msk.f32.mxu0 %vm101_vm0, %v49_v35 }
  0x4c   :  { %626 = vmatmul.mubr.msk.f32.gmra.mxu0 %vm101_vm0, %v50_v36 }
  0x4d   :  { %628 = vmatprep.mubr.msk.f32.mxu0 %vm101_vm0, %v51_v37 }
  0x50   :  { %629 = vmatmul.mubr.msk.f32.gmra.mxu0 %vm101_vm0, %v52_v38 }
  0x82   :  { %v99_v42 = vpop.permute.xlu0 %98  ;;  %v89_v43 = vpop.permute.xlu1 %88 }
  0x8a   :  { %v94_v47 = vpop.permute.xlu0 %93  ;;  %v84_v48 = vpop.permute.xlu1 %83 }
  0x8e   :  { %v79_v56 = vpop.permute.xlu0 %78  ;;  %v74_v57 = vpop.permute.xlu1 %73 }
  0x92   :  { %v69_v0 = vpop.permute.xlu0 %68  ;;  %v64_v1 = vpop.permute.xlu1 %63 }
  0x96   :  { %v313_v12 = vpop.permute.xlu0 %312  ;;  %v308_v14 = vpop.permute.xlu1 %307 }
  0x9a   :  { %v303_v18 = vpop.permute.xlu0 %302  ;;  %v298_v23 = vpop.permute.xlu1 %297 }
  0x9e   :  { %v422_v32 = vpop.permute.xlu0 %421 }
  0x9f   :  { %v427_v33 = vrot.slane %v422_v32, %v426_v31 }
 0x104   :  { %v621_v40 = vpop.f32.mrf.mxu0 }
 0x105   :  { %v246_v2 = vadd.f32 %v621_v40, %v69_v0 }
 0x106   :  { %v240_v41 = vpop.f32.mrf.mxu0 }
 0x107   :  { %v241_v4 = vadd.f32 %v240_v41, %v64_v1  ;;  %v280_v6 = vmax.f32 %v246_v2, 0.0 }
 0x108   :  { %v624_v44 = vpop.f32.mrf.mxu0 }
 0x109   :  { %v256_v60 = vadd.f32 %v624_v44, %v79_v56  ;;  %v279_v7 = vmax.f32 %v241_v4, 0.0 }
 0x10a   :  { %v250_v45 = vpop.f32.mrf.mxu0 }
 0x10b   :  { %v251_v62 = vadd.f32 %v250_v45, %v74_v57  ;;  %v282_v3 = vmax.f32 %v256_v60, 0.0 }
 0x10c   :  { %v627_v46 = vpop.f32.mrf.mxu0 }
 0x10d   :  { %v266_v53 = vadd.f32 %v627_v46, %v89_v43  ;;  %v281_v5 = vmax.f32 %v251_v62, 0.0 }
 0x10e   :  { %v260_v49 = vpop.f32.mrf.mxu0 }
 0x10f   :  { %v261_v58 = vadd.f32 %v260_v49, %v84_v48  ;;  %v284_v61 = vmax.f32 %v266_v53, 0.0 }
 0x110   :  { %v630_v50 = vpop.f32.mrf.mxu0 }
 0x111   :  { %v276_v51 = vadd.f32 %v630_v50, %v99_v42  ;;  %v283_v63 = vmax.f32 %v261_v58, 0.0 }
 0x112   :  { %v270_v52 = vpop.f32.mrf.mxu0 }
 0x113   :  { %v286_v54 = vmax.f32 %v276_v51, 0.0  ;;  %v271_v55 = vadd.f32 %v270_v52, %v94_v47 }
 0x115   :  { %v285_v59 = vmax.f32 %v271_v55, 0.0  ;;  %631 = vmatprep.subr.mxu1 %v286_v54 }
 0x116   :  { %632 = vmatpush3.msra.mxu1 %v286_v54 }
 0x117   :  { %633 = vmatprep.subr.mxu1 %v285_v59 }
 0x118   :  { %634 = vmatpush3.msra.mxu1 %v285_v59 }
 0x119   :  { %635 = vmatprep.subr.mxu1 %v284_v61 }
 0x11a   :  { %636 = vmatpush3.msra.mxu1 %v284_v61 }
 0x11b   :  { %637 = vmatprep.subr.mxu1 %v283_v63 }
 0x11c   :  { %638 = vmatpush3.msra.mxu1 %v283_v63 }
 0x11d   :  { %639 = vmatprep.subr.mxu1 %v282_v3 }
 0x11e   :  { %640 = vmatpush3.msra.mxu1 %v282_v3 }
 0x11f   :  { %641 = vmatprep.subr.mxu1 %v281_v5 }
 0x120   :  { %642 = vmatpush3.msra.mxu1 %v281_v5 }
 0x121   :  { %643 = vmatprep.subr.mxu1 %v280_v6 }
 0x122   :  { %644 = vmatpush3.msra.mxu1 %v280_v6 }
 0x123   :  { %645 = vmatprep.subr.mxu1 %v279_v7 }
 0x124   :  { %646 = vmatpush3.msra.mxu1 %v279_v7 }
 0x125   :  { %648 = vmatmul.mubr.msk.f32.vlgmr.msra.gmra.mxu1 %vm315_vm1, %v288_v8  ;;  %653 = vmatprep.subr.mxu1 %v693_v11 }
 0x126   :  { %650 = vmatprep.mubr.msk.f32.mxu1 %vm315_vm1, %v289_v9 }
 0x129   :  { %651 = vmatmul.mubr.msk.f32.gmra.mxu1 %vm315_vm1, %v290_v10 }
 0x12a   :  { %661 = vmatprep.mubr.msk.f32.mxu1 %vm694_vm2, %v693_v11 }
 0x1e5   :  { %v649_v13 = vpop.f32.mrf.mxu1 }
 0x1e6   :  { %v400_v20 = vadd.f32 %v649_v13, %v303_v18 }
 0x1e7   :  { %v394_v15 = vpop.f32.mrf.mxu1 }
 0x1e8   :  { %v395_v24 = vadd.f32 %v394_v15, %v298_v23  ;;  %v414_v26 = vmax.f32 %v400_v20, 0.0 }
 0x1e9   :  { %v652_v16 = vpop.f32.mrf.mxu1 }
 0x1ea   :  { %v410_v17 = vadd.f32 %v652_v16, %v313_v12  ;;  %v413_v27 = vmax.f32 %v395_v24, 0.0 }
 0x1eb   :  { %v404_v19 = vpop.f32.mrf.mxu1 }
 0x1ec   :  { %v416_v21 = vmax.f32 %v410_v17, 0.0  ;;  %v405_v22 = vadd.f32 %v404_v19, %v308_v14 }
 0x1ee   :  { %v415_v25 = vmax.f32 %v405_v22, 0.0  ;;  %654 = vmatpush3.msra.mxu1 %v416_v21 }
 0x1ef   :  { %655 = vmatprep.subr.mxu1 %v693_v11 }
 0x1f0   :  { %656 = vmatpush3.msra.mxu1 %v415_v25 }
 0x1f1   :  { %657 = vmatprep.subr.mxu1 %v693_v11 }
 0x1f2   :  { %658 = vmatpush3.msra.mxu1 %v414_v26 }
 0x1f3   :  { %659 = vmatprep.subr.mxu1 %v693_v11 }
 0x1f4   :  { %660 = vmatpush3.msra.mxu1 %v413_v27 }
 0x1f5   :  { %662 = vmatmul.mubr.msk.f32.vlgmr.msra.gmra.mxu1 %vm428_vm3, %v417_v28 }
 0x2b5   :  { %v498_v34 = vpop.f32.mrf.mxu1 }
 0x2b6   :  { %v499_v35 = vadd.f32 %v498_v34, %v427_v33 }
 0x2b7   :  { %v663_v36 = vpop.f32.mrf.mxu1 }
 0x2b8   :  { %502 = vst [vmem:[#allocation3] sm:$0x1] %v499_v35 }
 0x2b9   :  { %681 = shalt.err (!%p678_p4)
}
 0x2ba   :  { %512 = dma.vmem_to_hbm [thread:$0]  %s510_s6, 16, %s916_s7, [#allocation4]  }
 0x2bb   :  { %690 = dma.done.wait [#allocation4], 16  }
 0x2bc   :  { %691 = vsyncadd [#allocation4], 4294967280 }
 0x2bd   :  { %516 = vsyncpa [#allocation4], 1 }

</bundles_post_ra>
